<compile_context>
chip_gen: v6e
topology: v6e:2x2x1
jax: 0.10.0
libtpu: 0.0.40
codegen_flags: <defaults>
</compile_context>

<pallas_src>
import jax
import jax.numpy as jnp
from jax.experimental import pallas as pl
from jax.experimental.pallas import tpu as pltpu


def _round_up(x, m):
    return (x + m - 1) // m * m


def _vmem_capacity_bytes():
    """Physical VMEM of the local chip; falls back to the smallest current gen."""
    try:
        cap = getattr(pltpu.get_tpu_info(), "vmem_capacity_bytes", None)
        if cap:
            return int(cap)
    except Exception:
        pass
    return 64 << 20  # v7x has 64 MiB per TC; v5e/v6e have 128 MiB.


def _lora_pool_kernel(emb_ref, w_ref, b_ref, out_ref, pooled_ref):
    """Grid = (LoRA-row blocks, projection-column blocks).

    emb_ref:    (block_n, S, E)   LoRA description embeddings (native dtype)
    w_ref:      (E, block_d)      fused [Wk^T | Wv^T] / S, bf16
    b_ref:      (1, block_d)      fused [bk | bv], f32
    out_ref:    (block_n, block_d) pooled projections (f32, lane-dense)
    pooled_ref: (block_n, E)      scratch: seq-summed embeddings, matmul dtype
    """
    # Seq-mean folded before the matmul:
    #   mean_s(E @ W^T + b) == sum_s(E) @ (W^T / S) + b
    # Compute the seq reduction once per LoRA block (j == 0) and reuse it for
    # every projection-column block.
    @pl.when(pl.program_id(1) == 0)
    def _():
        pooled = jnp.sum(emb_ref[...], axis=1, dtype=jnp.float32)  # f32 accumulate
        pooled_ref[...] = pooled.astype(pooled_ref.dtype)

    proj = jnp.dot(pooled_ref[...], w_ref[...],
                   preferred_element_type=jnp.float32)             # bf16 x bf16 MXU
    out_ref[...] = proj + b_ref[...]                                # bias once / lora


def prepare_lora_pool_params(wk, bk, wv=None, bv=None, *, seq_len,
                             only_output_key=False, matmul_dtype=jnp.bfloat16):
    """One-time fusion of the K/V projection parameters (hoisted out of forward).

    Builds the fused (E, d_out) weight with the 1/seq_len mean scale folded in,
    cast to the MXU matmul dtype (bf16: ~3-8x MXU throughput and half the
    weight VMEM/DMA vs f32), plus the fused f32 bias, both zero-padded to a
    lane-dense multiple of 128 columns.
    """
    D, E = wk.shape
    if only_output_key:
        w = wk.T                                                 # (E, D)
        b = bk
        d_out = D
    else:
        assert wv is not None and bv is not None
        w = jnp.concatenate([wk.T, wv.T], axis=1)                # (E, 2D)
        b = jnp.concatenate([bk, bv], axis=0)                    # (2D,)
        d_out = 2 * D
    w = (w * (1.0 / float(seq_len))).astype(matmul_dtype)
    b = b.astype(jnp.float32)

    d_pad = max(128, _round_up(d_out, 128))
    w = jnp.pad(w, ((0, 0), (0, d_pad - d_out)))
    b = jnp.pad(b, (0, d_pad - d_out)).reshape(1, d_pad)
    return {"w": w, "b": b, "d_out": d_out, "seq_len": int(seq_len)}


def lora_pool_forward(embeddings, params, *, num_heads, head_dim,
                      only_output_key=False, block_n=None, block_d=None):
    """
    embeddings: (N, S, E)  float32 or bfloat16
    params:     output of prepare_lora_pool_params (same seq_len / only_output_key)
    returns keys_mean (N, H, Hd) [, values_mean (N, H, Hd)]
    """
    N, S, E = embeddings.shape
    D = num_heads * head_dim
    w, b, d_out = params["w"], params["b"], params["d_out"]
    assert params["seq_len"] == S, "params were fused for a different seq_len"
    assert w.shape[0] == E
    assert d_out == (D if only_output_key else 2 * D)

    emb_item = jnp.dtype(embeddings.dtype).itemsize
    w_item = jnp.dtype(w.dtype).itemsize

    cap = _vmem_capacity_bytes()
    # Working-set target: half the chip's physical VMEM, capped so the same
    # heuristic fits v7x (64 MiB) and v5e/v6e (128 MiB).
    vmem_budget = min(cap // 2, 36 << 20)

    # ---- projection-column tiling (only kicks in for production-sized weights) --
    d_pad0 = w.shape[1]
    if block_d is None:
        if E * d_pad0 * w_item <= (8 << 20):
            block_d = d_pad0                       # whole fused weight stays resident
        else:
            block_d = max(512, (8 << 20) // (E * w_item) // 128 * 128)
            block_d = min(block_d, d_pad0)
    d_pad = _round_up(d_pad0, block_d)
    grid_d = d_pad // block_d
    if d_pad > d_pad0:                             # rare: column tiling needs extra pad
        w = jnp.pad(w, ((0, 0), (0, d_pad - d_pad0)))
        b = jnp.pad(b, ((0, 0), (0, d_pad - d_pad0)))

    # ---- LoRA-row tiling: biggest block that fits the per-chip VMEM budget ----
    def vmem_est(bn, bd):
        return (2 * bn * S * E * emb_item                         # dbl-buffered emb
                + (1 if grid_d == 1 else 2) * E * bd * w_item     # weight buffer(s)
                + (1 if grid_d == 1 else 2) * bd * 4              # bias buffer(s)
                + 2 * bn * bd * 4                                 # dbl-buffered f32 out
                + bn * S * E * 4                                  # worst-case f32 reduce temp
                + bn * E * (4 + w_item)                           # f32 sum + pooled scratch
                + bn * bd * 4)                                    # dot result pre-bias

    if block_n is None:
        block_n = min(N, 256)
        while block_n > 8 and vmem_est(block_n, block_d) > vmem_budget:
            block_n //= 2
    # (8,128) rule on the output block: block_n must be a multiple of 8 or == N.
    if block_n < N:
        block_n = min(N, max(8, _round_up(block_n, 8)))
    block_n = min(block_n, N)
    grid_n = pl.cdiv(N, block_n)

    est = vmem_est(block_n, block_d)
    # Only override the scoped-VMEM default when the estimate approaches v5e's
    # 16 MiB default; clamp to the chip's physical capacity minus headroom.
    vmem_limit = (int(min(est + est // 4, cap - (4 << 20)))
                  if est > (12 << 20) else None)

    emb_spec = pl.BlockSpec((block_n, S, E), lambda i, j: (i, 0, 0))
    if grid_d == 1:
        # Constant index_map across the whole grid -> single-buffer the resident
        # weight/bias instead of wasting a second VMEM buffer on them.
        w_spec = pl.BlockSpec((E, block_d), lambda i, j: (0, 0),
                              pipeline_mode=pl.Buffered(1))
        b_spec = pl.BlockSpec((1, block_d), lambda i, j: (0, 0),
                              pipeline_mode=pl.Buffered(1))
    else:
        w_spec = pl.BlockSpec((E, block_d), lambda i, j: (0, j))
        b_spec = pl.BlockSpec((1, block_d), lambda i, j: (0, j))

    out = pl.pallas_call(
        _lora_pool_kernel,
        out_shape=jax.ShapeDtypeStruct((N, d_pad), jnp.float32),
        grid_spec=pltpu.PrefetchScalarGridSpec(
            num_scalar_prefetch=0,
            grid=(grid_n, grid_d),
            in_specs=[emb_spec, w_spec, b_spec],
            out_specs=pl.BlockSpec((block_n, block_d), lambda i, j: (i, j)),
            scratch_shapes=[pltpu.VMEM((block_n, E), w.dtype)],
        ),
        compiler_params=pltpu.CompilerParams(
            # j ("arbitrary") must stay in-order so the j==0 pooled scratch is
            # valid for j>0; i is independent -> megacore-shardable on v7x.
            dimension_semantics=("parallel", "arbitrary"),
            vmem_limit_bytes=vmem_limit),
    )(embeddings, w, b)

    keys = out[:, :D].reshape(N, num_heads, head_dim)
    if only_output_key:
        return keys
    values = out[:, D:2 * D].reshape(N, num_heads, head_dim)
    return keys, values


if __name__ == "__main__":
    # Small shapes consistent with the module's forward.
    num_loras, seq_len, embed_dim = 2, 8, 32
    num_heads, head_dim = 4, 8
    total_dim = num_heads * head_dim

    key = jax.random.PRNGKey(0)
    k_emb, k_wk, k_bk, k_wv, k_bv = jax.random.split(key, 5)

    # TODO(synk): tokenizer/text_encoder (encode_lora_descriptions) has no Pallas
    # equivalent; deterministic synthetic bf16 "text-encoder" embeddings stand in.
    embeddings = jax.random.normal(
        k_emb, (num_loras, seq_len, embed_dim), dtype=jnp.float32
    ).astype(jnp.bfloat16)

    # Deterministic nn.Linear-style init (uniform in +/- 1/sqrt(fan_in)).
    bound = 1.0 / (embed_dim ** 0.5)
    wk = jax.random.uniform(k_wk, (total_dim, embed_dim), minval=-bound, maxval=bound,
                            dtype=jnp.float32)
    bk = jax.random.uniform(k_bk, (total_dim,), minval=-bound, maxval=bound,
                            dtype=jnp.float32)
    wv = jax.random.uniform(k_wv, (total_dim, embed_dim), minval=-bound, maxval=bound,
                            dtype=jnp.float32)
    bv = jax.random.uniform(k_bv, (total_dim,), minval=-bound, maxval=bound,
                            dtype=jnp.float32)

    # One-time parameter fusion, hoisted out of the per-forward path.
    kv_params = prepare_lora_pool_params(wk, bk, wv, bv, seq_len=seq_len)
    k_params = prepare_lora_pool_params(wk, bk, seq_len=seq_len,
                                        only_output_key=True)

    keys_out, values_out = lora_pool_forward(
        embeddings, kv_params, num_heads=num_heads, head_dim=head_dim)
    keys_only = lora_pool_forward(
        embeddings, k_params, num_heads=num_heads, head_dim=head_dim,
        only_output_key=True)
    jax.block_until_ready((keys_out, values_out, keys_only))

    # Correctness check against a plain-JAX f32 reference on the same bf16
    # embeddings (kernel does the matmul in bf16 with f32 accumulation, hence
    # the slightly relaxed tolerance).
    emb_f32 = embeddings.astype(jnp.float32)
    ref_k = (emb_f32 @ wk.T + bk).reshape(
        num_loras, seq_len, num_heads, head_dim).mean(axis=1)
    ref_v = (emb_f32 @ wv.T + bv).reshape(
        num_loras, seq_len, num_heads, head_dim).mean(axis=1)
    assert jnp.allclose(keys_out, ref_k, atol=1e-2, rtol=1e-2)
    assert jnp.allclose(values_out, ref_v, atol=1e-2, rtol=1e-2)
    assert jnp.allclose(keys_only, ref_k, atol=1e-2, rtol=1e-2)

    print("KERNEL_OK")
</pallas_src>

<mosaic_0001>
module attributes {stable_mosaic.version = 11 : i64} {
  func.func @_lora_pool_kernel(%arg0: i32, %arg1: i32, %arg2: memref<2x8x32xbf16, #tpu.memory_space<vmem>>, %arg3: memref<32x128xbf16, #tpu.memory_space<vmem>>, %arg4: memref<1x128xf32, #tpu.memory_space<vmem>>, %arg5: memref<2x128xf32, #tpu.memory_space<vmem>>, %arg6: memref<2x32xbf16, #tpu.memory_space<vmem>>) attributes {dimension_semantics = [#tpu.dimension_semantics<parallel>, #tpu.dimension_semantics<arbitrary>], iteration_bounds = array<i64: 1, 1>, scalar_prefetch = 0 : i64, scratch_operands = 1 : i64, tpu.core_type = #tpu.core_type<tc>, window_params = [{transform_indices = @transform_0, window_bounds = array<i64: 2, 8, 32>}, {pipeline_mode = #tpu.pipeline_mode<synchronous>, transform_indices = @transform_1, window_bounds = array<i64: 32, 128>}, {pipeline_mode = #tpu.pipeline_mode<synchronous>, transform_indices = @transform_2, window_bounds = array<i64: 1, 128>}, {transform_indices = @transform_3, window_bounds = array<i64: 2, 128>}]} {
    %c0_i32 = arith.constant 0 : i32
    %0 = arith.cmpi eq, %arg1, %c0_i32 : i32
    %1 = arith.extui %0 : i1 to i32
    %c0_i32_0 = arith.constant 0 : i32
    %2 = arith.cmpi ne, %1, %c0_i32_0 : i32
    scf.if %2 {
      %c0_8 = arith.constant 0 : index
      %c0_9 = arith.constant 0 : index
      %c0_10 = arith.constant 0 : index
      %10 = vector.load %arg2[%c0_8, %c0_9, %c0_10] : memref<2x8x32xbf16, #tpu.memory_space<vmem>>, vector<2x8x32xbf16>
      %11 = arith.extf %10 : vector<2x8x32xbf16> to vector<2x8x32xf32>
      %cst_11 = arith.constant dense<0.000000e+00> : vector<2x32xf32>
      %12 = vector.multi_reduction <add>, %11, %cst_11 [1] : vector<2x8x32xf32> to vector<2x32xf32>
      %13 = arith.truncf %12 : vector<2x32xf32> to vector<2x32xbf16>
      %c0_12 = arith.constant 0 : index
      %c0_13 = arith.constant 0 : index
      %14 = vector.load %arg6[%c0_12, %c0_13] : memref<2x32xbf16, #tpu.memory_space<vmem>>, vector<2x32xbf16>
      tpu.vector_store %arg6[%c0_12, %c0_13], %13 {strides = array<i32>} : memref<2x32xbf16, #tpu.memory_space<vmem>>, vector<2x32xbf16>,
    } else {
    }
    %c0 = arith.constant 0 : index
    %c0_1 = arith.constant 0 : index
    %3 = vector.load %arg6[%c0, %c0_1] : memref<2x32xbf16, #tpu.memory_space<vmem>>, vector<2x32xbf16>
    %c0_2 = arith.constant 0 : index
    %c0_3 = arith.constant 0 : index
    %4 = vector.load %arg3[%c0_2, %c0_3] : memref<32x128xbf16, #tpu.memory_space<vmem>>, vector<32x128xbf16>
    %cst = arith.constant dense<0.000000e+00> : vector<2x128xf32>
    %5 = tpu.matmul %3, %4, %cst {dimension_numbers = #tpu.dot_dimension_numbers<[1], [0], [0], [1], [0, 0, 1, 1], [], []>} : vector<2x32xbf16>, vector<32x128xbf16>, vector<2x128xf32> -> vector<2x128xf32>
    %c0_4 = arith.constant 0 : index
    %c0_5 = arith.constant 0 : index
    %6 = vector.load %arg4[%c0_4, %c0_5] : memref<1x128xf32, #tpu.memory_space<vmem>>, vector<1x128xf32>
    %7 = vector.broadcast %6 : vector<1x128xf32> to vector<2x128xf32>
    %8 = arith.addf %5, %7 : vector<2x128xf32>
    %c0_6 = arith.constant 0 : index
    %c0_7 = arith.constant 0 : index
    %9 = vector.load %arg5[%c0_6, %c0_7] : memref<2x128xf32, #tpu.memory_space<vmem>>, vector<2x128xf32>
    tpu.vector_store %arg5[%c0_6, %c0_7], %8 {strides = array<i32>} : memref<2x128xf32, #tpu.memory_space<vmem>>, vector<2x128xf32>,
    return
  }
  func.func @transform_0(%arg0: i32, %arg1: i32) -> (i32, i32, i32) {
    %c0_i32 = arith.constant 0 : i32
    %c0_i32_0 = arith.constant 0 : i32
    %c0_i32_1 = arith.constant 0 : i32
    return %arg0, %c0_i32, %c0_i32_0 : i32, i32, i32
  }
  func.func @transform_1(%arg0: i32, %arg1: i32) -> (i32, i32) {
    %c0_i32 = arith.constant 0 : i32
    %c0_i32_0 = arith.constant 0 : i32
    %c0_i32_1 = arith.constant 0 : i32
    return %c0_i32, %c0_i32_0 : i32, i32
  }
  func.func @transform_2(%arg0: i32, %arg1: i32) -> (i32, i32) {
    %c0_i32 = arith.constant 0 : i32
    %c0_i32_0 = arith.constant 0 : i32
    %c0_i32_1 = arith.constant 0 : i32
    return %c0_i32, %c0_i32_0 : i32, i32
  }
  func.func @transform_3(%arg0: i32, %arg1: i32) -> (i32, i32) {
    %c0_i32 = arith.constant 0 : i32
    return %arg0, %arg1 : i32, i32
  }
}

</mosaic_0001>

<bundles_post_ra>
// kernel: tpu_custom_call.1
= control target key start
LH: loop header
LB: loop body
LE: loop exit
PB: predicated region body
PF: predicated region fallthrough
CT: control target
= control target key end

     0   :  { %8 = vsyncpa [#allocation4], 0  ;;  %s375_s0 = inlined_call_operand.hbm [shape: bf16[2,8,32], index: 0, kind: input, shape index: {}]   ;;  %s376_s1 = inlined_call_operand.hbm [shape: bf16[32,128], index: 1, kind: input, shape index: {}]   ;;  %s377_s2 = inlined_call_operand.vmem [shape: f32[1,128], index: 2, kind: input, shape index: {}]   ;;  %s378_s3 = inlined_call_operand.hbm [shape: f32[2,128], index: 3, kind: output, shape index: {}]  }
   0x1   :  { %9 = vsyncpa [#allocation7], 0 }
   0x2   :  { %10 = vsyncpa [#allocation5], 0  ;;  %s331_s12 = smov [#allocation3]  }
   0x3   :  { %s16_s13 = sshll.u32 %s331_s12, 4  ;;  %s17_s13 = int_to_ptr.vmem [resolvable:$true] %s16_s13 }
   0x4   :  { %s273_s14 = scalar_lea.vmem %s17_s13, 128  ;;  %p278_p1 = scmp.lt.s32.totalorder %s17_s13, %s17_s13 }
   0x5   :  { %p274_p0 = scmp.ne.s32.totalorder %s17_s13, %s273_s14  ;;  %p279_p2 = scmp.lt.s32.totalorder %s273_s14, %s273_s14 }
   0x7   :  { %p280_p3 = por %p279_p2, %p278_p1 }
   0x9   :  { %p281_p4 = pnand %p280_p3, %p274_p0 }
   0xb   :  { %284 = shalt.err (!%p281_p4)
}
   0xc   :  { %s332_s15 = smov 64   ;;  %s333_s16 = smov 4  }
   0xd   :  { %22 = dma.hbm_to_vmem [thread:$0]  %s375_s0, 128, %s17_s13, [#allocation4], %s332_s15, %s332_s15, %s333_s16  }
   0xe   :  { %s334_s19 = smov [#allocation6]  }
   0xf   :  { %s28_s20 = sshll.u32 %s334_s19, 4  ;;  %s29_s20 = int_to_ptr.vmem [resolvable:$true] %s28_s20 }
  0x10   :  { %s293_s21 = scalar_lea.vmem %s29_s20, 256  ;;  %p298_p6 = scmp.lt.s32.totalorder %s29_s20, %s29_s20 }
  0x11   :  { %p294_p5 = scmp.ne.s32.totalorder %s29_s20, %s293_s21  ;;  %p299_p7 = scmp.lt.s32.totalorder %s293_s21, %s293_s21 }
  0x13   :  { %p300_p8 = por %p299_p7, %p298_p6 }
  0x15   :  { %p301_p9 = pnand %p300_p8, %p294_p5 }
  0x17   :  { %304 = shalt.err (!%p301_p9)
}
  0x18   :  { %34 = dma.hbm_to_vmem [thread:$0]  %s376_s1, 256, %s29_s20, [#allocation7], %s332_s15, %s332_s15, %s333_s16  }
  0x19   :  { %325 = dma.done.wait [#allocation4], 128  }
  0x1a   :  { %326 = vsyncadd [#allocation4], 4294967168 }
  0x1b   :  { %327 = dma.done.wait [#allocation7], 256  }
  0x1c   :  { %328 = vsyncadd [#allocation7], 4294967040  ;;  %v335_v0 = vmov 0.0   ;;  %vm336_vm0 = vmmov 0   ;;  %v263_v1 = vld [vmem:[#allocation6 + $0x8] sm:$0xff]   ;;  %v264_v2 = vld [vmem:[#allocation6] sm:$0xff]   ;;  %v74_v10 = vlaneseq }
  0x1d   :  { %246 = vmatprep.subr.bf16.mxu0 %v335_v0  ;;  %250 = vmatprep.mubr.msk.bf16.mxu0 %vm336_vm0, %v335_v0  ;;  %v240_v3 = vld [vmem:[#allocation3] sm:$0xff]   ;;  %vm52_vm1 = vcmask 261120   ;;  %v337_v13 = vmov 1966171168   ;;  %v338_v21 = vmov 1935823168  }
  0x1e   :  { %247 = vmatpush3.bf16.msra.mxu0 %v263_v1  ;;  %v241_v4 = vunpack.c.l.bf16 %v240_v3  ;;  %v242_v5 = vunpack.c.h.bf16 %v240_v3  ;;  %v72_v14 = vunpack.c.l.s4 %v337_v13  ;;  %v75_v17 = vshrl.u32 %v74_v10, 7  ;;  %v235_v48 = vld [vmem:[%s377_s2] ss:$0 sm:$0xff]  ;;  %s339_s24 = smov [#allocation8]  }
  0x1f   :  { %248 = vmatprep.subr.bf16.mxu0 %v335_v0  ;;  %v100_v22 = vunpack.c.l.s4 %v338_v21  ;;  %vm130_vm2 = vcmask 1041409   ;;  %vm148_vm3 = vcmask 253952   ;;  %s225_s25 = sshll.u32 %s339_s24, 4  ;;  %s226_s25 = int_to_ptr.vmem [resolvable:$true] %s225_s25 }
  0x20   :  { %v53_v6 = vsel %vm52_vm1, %v241_v4, 0.0  ;;  %v60_v7 = vsel %vm52_vm1, %v242_v5, 0.0  ;;  %v73_v20 = vunpack.c.0.s8 %v72_v14  ;;  %s305_s26 = scalar_lea.vmem %s226_s25, 32  ;;  %p310_p11 = scmp.lt.s32.totalorder %s226_s25, %s226_s25 }
  0x21   :  { %v54_v8 = vrot.slane %v53_v6, 4  ;;  %v61_v9 = vrot.slane %v60_v7, 4  ;;  %v101_v28 = vunpack.c.0.s8 %v100_v22  ;;  %p306_p10 = scmp.ne.s32.totalorder %s226_s25, %s305_s26  ;;  %p311_p12 = scmp.lt.s32.totalorder %s305_s26, %s305_s26 }
  0x22   :  { %249 = vmatpush3.bf16.msra.mxu0 %v264_v2  ;;  %v76_v27 = vsub.s32 %v73_v20, %v75_v17 }
  0x23   :  { %v55_v11 = vadd.f32 %v54_v8, %v53_v6  ;;  %v62_v12 = vadd.f32 %v61_v9, %v60_v7  ;;  %v104_v33 = vsub.s32 %v101_v28, %v75_v17  ;;  %p312_p13 = por %p311_p12, %p310_p11 }
  0x25   :  { %v56_v15 = vrot.slane %v55_v11, 2  ;;  %v63_v16 = vrot.slane %v62_v12, 2  ;;  %p313_p0 = pnand %p312_p13, %p306_p10 }
  0x27   :  { %v57_v18 = vadd.f32 %v56_v15, %v55_v11  ;;  %v64_v19 = vadd.f32 %v63_v16, %v62_v12 }
  0x29   :  { %v58_v23 = vrot.slane %v57_v18, 1  ;;  %v65_v24 = vrot.slane %v64_v19, 1 }
  0x2b   :  { %v59_v25 = vadd.f32 %v58_v23, %v57_v18  ;;  %v66_v26 = vadd.f32 %v65_v24, %v64_v19 }
  0x2d   :  { %v67_v29 = vpack.c.bf16 %v59_v25, %v59_v25  ;;  %v68_v30 = vpack.c.bf16 %v66_v26, %v66_v26 }
  0x2f   :  { %v77_v31 = vrot.slane %v67_v29, %v76_v27  ;;  %v91_v32 = vrot.slane %v68_v30, %v76_v27 }
  0x31   :  { %v84_v34 = vrot.slane %v77_v31, %v76_v27  ;;  %v98_v35 = vrot.slane %v91_v32, %v76_v27 }
  0x33   :  { %v105_v36 = vrot.slane %v84_v34, %v104_v33  ;;  %v119_v37 = vrot.slane %v98_v35, %v104_v33 }
  0x35   :  { %v112_v38 = vrot.slane %v105_v36, %v104_v33  ;;  %v126_v39 = vrot.slane %v119_v37, %v104_v33 }
  0x37   :  { %v127_v40 = vunpack.c.l.b16 %v112_v38  ;;  %v128_v41 = vunpack.c.l.b16 %v126_v39 }
  0x39   :  { %v129_v42 = vrot.slane %v128_v41, 7 }
  0x3b   :  { %v131_v43 = vsel %vm130_vm2, %v129_v42, %v127_v40 }
  0x3c   :  { %v132_v44 = vpack.c.b16 %v131_v43, %v131_v43 }
  0x3e   :  { %v139_v45 = vrot.slane %v132_v44, %v76_v27 }
  0x40   :  { %v146_v46 = vrot.slane %v139_v45, %v76_v27 }
  0x42   :  { %149 = vst.msk [vmem:[#allocation2] sm:$0x1] %vm148_vm3, %v146_v46 }
  0x49   :  { %v150_v47 = vld [vmem:[#allocation2] sm:$0x1] }
  0x4a   :  { %251 = vmatmul.mubr.msk.bf16.vlgmr.msra.gmra.mxu0 %vm52_vm1, %v150_v47 }
 0x10a   :  { %v212_v49 = vpop.f32.mrf.mxu0 }
 0x10b   :  { %v213_v50 = vadd.f32 %v235_v48, %v212_v49 }
 0x10c   :  { %v252_v51 = vpop.f32.mrf.mxu0 }
 0x10d   :  { %218 = vst [vmem:[#allocation8] sm:$0x3] %v213_v50 }
 0x10e   :  { %v215_v52 = vpop.f32.mrf.mxu0 }
 0x10f   :  { %316 = shalt.err (!%p313_p0)
}
 0x110   :  { %228 = dma.vmem_to_hbm [thread:$0]  %s226_s25, 32, %s378_s3, [#allocation5]   ;;  %v253_v53 = vpop.f32.mrf.mxu0 }
 0x111   :  { %329 = dma.done.wait [#allocation5], 32  }
 0x112   :  { %330 = vsyncadd [#allocation5], 4294967264 }
 0x113   :  { %232 = vsyncpa [#allocation4], 1 }
 0x114   :  { %233 = vsyncpa [#allocation7], 1 }
 0x115   :  { %234 = vsyncpa [#allocation5], 1 }

</bundles_post_ra>
